<compile_context>
chip_gen: v7x
topology: tpu7x:2x2x1
jax: 0.10.0
libtpu: 0.0.40
codegen_flags: <defaults>
</compile_context>

<pallas_src>
import jax
import jax.numpy as jnp
from jax.experimental import pallas as pl
from jax.experimental.pallas import tpu as pltpu

# ----- small, deterministic hyper-parameters (consistent with the module) -----
BATCH        = 2
SEQ_LENGTH   = 32
INPUT_SIZE   = 1
KERNEL_SIZE  = 3
NUM_FILTERS  = 16
HIDDEN_SIZE  = 32
OUTPUT_SIZE  = 3
DROPOUT_PROB = 0.3        # inference: dropout is identity

L1   = SEQ_LENGTH - (KERNEL_SIZE - 1)    # after conv1 (valid conv)
L2   = L1 - (KERNEL_SIZE - 1)            # after conv2
L3   = L2 // 2                           # after MaxPool1d(kernel_size=2)
FLAT = NUM_FILTERS * L3                  # fc1 input features
BF   = BATCH * NUM_FILTERS               # (batch, channel) packed on lanes
OUT_PAD = 128                            # lane-dense output slab width


def cnn_kernel(x_ref, w1_ref, b1_ref, w2_ref, b2_ref,
               wfc1_ref, bfc1_ref, wfc2_ref, bfc2_ref,
               out_ref, cols_scr, flat_scr):
    """All refs are whole arrays resident in VMEM (no grid).

    x_ref   : (L0, B*F)       input replicated across channel lanes
    w1_ref  : (K, B*F)        conv1 taps, tiled over batch lanes
    w2_ref  : (K*B*F, B*F)    conv2 im2col weight, block-diagonal over batch
    wfc1_ref: (FLAT, H)       fc1 weight, reordered for the kernel's flatten
    wfc2_ref: (H, 128)        fc2 weight zero-padded to 128 output lanes
    """
    F = NUM_FILTERS

    # ---------- conv1 + ReLU on the VPU (in_channels = 1): (L1, B*F)
    h1 = jnp.zeros((L1, BF), jnp.float32) + b1_ref[...]
    for k in range(KERNEL_SIZE):
        h1 = h1 + x_ref[k:k + L1, :] * w1_ref[k:k + 1, :]
    h1 = jnp.maximum(h1, 0.0)

    # ---------- conv2 + ReLU: single im2col MXU matmul
    # cols[t, k*BF + b*F + ci] = h1[t + k, b*F + ci]
    for k in range(KERNEL_SIZE):
        cols_scr[:, k * BF:(k + 1) * BF] = h1[k:k + L2, :]
    h2 = jnp.dot(cols_scr[...], w2_ref[...],
                 preferred_element_type=jnp.float32)        # (L2, B*F)
    h2 = jnp.maximum(h2 + b2_ref[...], 0.0)

    # ---------- MaxPool1d(2) over time (VPU) + flatten into (B, FLAT) scratch
    # flat[b, s*F + f] = max(h2[2s, b*F + f], h2[2s+1, b*F + f])
    for s in range(L3):
        m = jnp.maximum(h2[2 * s:2 * s + 1, :],
                        h2[2 * s + 1:2 * s + 2, :])          # (1, B*F)
        for b in range(BATCH):
            flat_scr[b:b + 1, s * F:(s + 1) * F] = m[:, b * F:(b + 1) * F]

    # ---------- fc1 + ReLU: single matmul (B, FLAT) @ (FLAT, H)
    y = jnp.dot(flat_scr[...], wfc1_ref[...],
                preferred_element_type=jnp.float32) + bfc1_ref[...]
    y = jnp.maximum(y, 0.0)

    # TODO(synk): nn.Dropout is eval-mode identity here (no stochastic mask).

    # ---------- fc2 + sigmoid into a lane-dense (B, 128) slab; EUP reciprocal
    logits = jnp.dot(y, wfc2_ref[...],
                     preferred_element_type=jnp.float32) + bfc2_ref[...]
    out_ref[...] = pl.reciprocal(1.0 + jnp.exp(-logits), approx=True)


def cnn_forward(x, params):
    """x: (B, seq, input_size=1) float32, NLC. Returns (B, output_size)."""
    conv1_w, conv1_b, conv2_w, conv2_b, fc1_w, fc1_b, fc2_w, fc2_b = params
    F, B, K, H = NUM_FILTERS, BATCH, KERNEL_SIZE, HIDDEN_SIZE

    # --- host-side (plain JAX) re-layout: time on sublanes, (b, f) on lanes ---
    # input replicated across the F channel lanes: xr[t, b*F+f] = x[b, t, 0]
    xr = jnp.repeat(jnp.transpose(x[:, :, 0].astype(jnp.float32)), F, axis=1)

    # conv1: w1r[k, b*F+f] = conv1_w[f, 0, k]
    w1r = jnp.tile(jnp.transpose(conv1_w[:, 0, :], (1, 0)), (1, B))   # (K, B*F)
    b1r = jnp.tile(conv1_b.reshape(1, F), (1, B))                     # (1, B*F)

    # conv2 as an im2col matmul with a block-diagonal (over batch) weight:
    # w2blk[k*B*F + b*F + ci, b'*F + co] = conv2_w[co, ci, k] * (b == b')
    w2_t = jnp.transpose(conv2_w, (2, 1, 0))                          # (K, Cin, Cout)
    w2blk = jnp.concatenate(
        [jnp.kron(jnp.eye(B, dtype=jnp.float32), w2_t[k]) for k in range(K)],
        axis=0)                                                       # (K*B*F, B*F)
    b2r = jnp.tile(conv2_b.reshape(1, F), (1, B))                     # (1, B*F)

    # fc1: kernel flatten index is s*F + f; PyTorch's channel-major flatten is
    # f*L3 + s  =>  wfc1[s*F + f, h] = fc1_w[h, f*L3 + s]
    wfc1 = jnp.transpose(fc1_w.reshape(H, F, L3), (2, 1, 0)).reshape(L3 * F, H)
    bfc1 = fc1_b.reshape(1, H)

    # fc2 padded to a lane-dense 128-wide output slab
    wfc2p = jnp.zeros((H, OUT_PAD), jnp.float32).at[:, :OUTPUT_SIZE].set(
        jnp.transpose(fc2_w, (1, 0)))
    bfc2p = jnp.zeros((1, OUT_PAD), jnp.float32).at[:, :OUTPUT_SIZE].set(
        fc2_b.reshape(1, OUTPUT_SIZE))

    vmem_spec = pl.BlockSpec(memory_space=pltpu.MemorySpace.VMEM)
    out_padded = pl.pallas_call(
        cnn_kernel,
        out_shape=jax.ShapeDtypeStruct((B, OUT_PAD), jnp.float32),
        in_specs=[vmem_spec] * 9,
        out_specs=vmem_spec,
        scratch_shapes=[
            pltpu.VMEM((L2, K * BF), jnp.float32),   # im2col buffer
            pltpu.VMEM((B, FLAT), jnp.float32),      # pooled+flattened acts
        ],
    )(xr, w1r, b1r, w2blk, b2r, wfc1, bfc1, wfc2p, bfc2p)
    return out_padded[:, :OUTPUT_SIZE]


# ----------------------------- pure-JAX reference -----------------------------
def reference(x, params):
    conv1_w, conv1_b, conv2_w, conv2_b, fc1_w, fc1_b, fc2_w, fc2_b = params
    xc = jnp.transpose(x, (0, 2, 1))                      # NCL, like PyTorch

    def conv1d(inp, w, b):
        out = jax.lax.conv_general_dilated(
            inp, w, window_strides=(1,), padding="VALID",
            dimension_numbers=("NCH", "OIH", "NCH"))
        return out + b[None, :, None]

    h1 = jax.nn.relu(conv1d(xc, conv1_w, conv1_b))
    h2 = jax.nn.relu(conv1d(h1, conv2_w, conv2_b))
    B, C, Lc = h2.shape
    pooled = jnp.max(h2[:, :, : (Lc // 2) * 2].reshape(B, C, Lc // 2, 2), axis=-1)
    flat = pooled.reshape(B, -1)                          # channel-major flatten
    y = jax.nn.relu(flat @ fc1_w.T + fc1_b)               # dropout = identity (eval)
    return jax.nn.sigmoid(y @ fc2_w.T + fc2_b)


if __name__ == "__main__":
    key = jax.random.PRNGKey(0)
    ks = jax.random.split(key, 9)
    params = (
        0.30 * jax.random.normal(ks[0], (NUM_FILTERS, INPUT_SIZE, KERNEL_SIZE), jnp.float32),
        0.10 * jax.random.normal(ks[1], (NUM_FILTERS,), jnp.float32),
        0.10 * jax.random.normal(ks[2], (NUM_FILTERS, NUM_FILTERS, KERNEL_SIZE), jnp.float32),
        0.10 * jax.random.normal(ks[3], (NUM_FILTERS,), jnp.float32),
        0.05 * jax.random.normal(ks[4], (HIDDEN_SIZE, FLAT), jnp.float32),
        0.10 * jax.random.normal(ks[5], (HIDDEN_SIZE,), jnp.float32),
        0.10 * jax.random.normal(ks[6], (OUTPUT_SIZE, HIDDEN_SIZE), jnp.float32),
        0.10 * jax.random.normal(ks[7], (OUTPUT_SIZE,), jnp.float32),
    )
    x = jax.random.normal(ks[8], (BATCH, SEQ_LENGTH, INPUT_SIZE), jnp.float32)

    out = jax.block_until_ready(jax.jit(cnn_forward)(x, params))
    ref = jax.block_until_ready(reference(x, params))

    assert out.shape == (BATCH, OUTPUT_SIZE)
    assert bool(jnp.all(jnp.isfinite(out)))
    assert bool(jnp.allclose(out, ref, atol=1e-2, rtol=1e-2)), (out, ref)
    print("KERNEL_OK")
</pallas_src>

<mosaic_0001>
module attributes {stable_mosaic.version = 11 : i64} {
  func.func @cnn_kernel(%arg0: memref<32x32xf32, #tpu.memory_space<vmem>>, %arg1: memref<3x32xf32, #tpu.memory_space<vmem>>, %arg2: memref<1x32xf32, #tpu.memory_space<vmem>>, %arg3: memref<96x32xf32, #tpu.memory_space<vmem>>, %arg4: memref<1x32xf32, #tpu.memory_space<vmem>>, %arg5: memref<224x32xf32, #tpu.memory_space<vmem>>, %arg6: memref<1x32xf32, #tpu.memory_space<vmem>>, %arg7: memref<32x128xf32, #tpu.memory_space<vmem>>, %arg8: memref<1x128xf32, #tpu.memory_space<vmem>>, %arg9: memref<2x128xf32, #tpu.memory_space<vmem>>, %arg10: memref<28x96xf32, #tpu.memory_space<vmem>>, %arg11: memref<2x224xf32, #tpu.memory_space<vmem>>) attributes {dimension_semantics = [], scalar_prefetch = 0 : i64, scratch_operands = 2 : i64, tpu.core_type = #tpu.core_type<tc>} {
    %cst = arith.constant 0.000000e+00 : f32
    %0 = vector.broadcast %cst : f32 to vector<30x32xf32>
    %c0 = arith.constant 0 : index
    %c0_0 = arith.constant 0 : index
    %1 = vector.load %arg2[%c0, %c0_0] : memref<1x32xf32, #tpu.memory_space<vmem>>, vector<1x32xf32>
    %2 = vector.broadcast %1 : vector<1x32xf32> to vector<30x32xf32>
    %3 = arith.addf %0, %2 : vector<30x32xf32>
    %c0_1 = arith.constant 0 : index
    %c0_2 = arith.constant 0 : index
    %4 = vector.load %arg0[%c0_1, %c0_2] : memref<32x32xf32, #tpu.memory_space<vmem>>, vector<30x32xf32>
    %c0_3 = arith.constant 0 : index
    %c0_4 = arith.constant 0 : index
    %5 = vector.load %arg1[%c0_3, %c0_4] : memref<3x32xf32, #tpu.memory_space<vmem>>, vector<1x32xf32>
    %6 = vector.broadcast %5 : vector<1x32xf32> to vector<30x32xf32>
    %7 = arith.mulf %4, %6 : vector<30x32xf32>
    %8 = arith.addf %3, %7 : vector<30x32xf32>
    %c1 = arith.constant 1 : index
    %c0_5 = arith.constant 0 : index
    %9 = vector.load %arg0[%c1, %c0_5] : memref<32x32xf32, #tpu.memory_space<vmem>>, vector<30x32xf32>
    %c1_6 = arith.constant 1 : index
    %c0_7 = arith.constant 0 : index
    %10 = vector.load %arg1[%c1_6, %c0_7] : memref<3x32xf32, #tpu.memory_space<vmem>>, vector<1x32xf32>
    %11 = vector.broadcast %10 : vector<1x32xf32> to vector<30x32xf32>
    %12 = arith.mulf %9, %11 : vector<30x32xf32>
    %13 = arith.addf %8, %12 : vector<30x32xf32>
    %c2 = arith.constant 2 : index
    %c0_8 = arith.constant 0 : index
    %14 = vector.load %arg0[%c2, %c0_8] : memref<32x32xf32, #tpu.memory_space<vmem>>, vector<30x32xf32>
    %c2_9 = arith.constant 2 : index
    %c0_10 = arith.constant 0 : index
    %15 = vector.load %arg1[%c2_9, %c0_10] : memref<3x32xf32, #tpu.memory_space<vmem>>, vector<1x32xf32>
    %16 = vector.broadcast %15 : vector<1x32xf32> to vector<30x32xf32>
    %17 = arith.mulf %14, %16 : vector<30x32xf32>
    %18 = arith.addf %13, %17 : vector<30x32xf32>
    %cst_11 = arith.constant 0.000000e+00 : f32
    %19 = vector.broadcast %cst_11 : f32 to vector<30x32xf32>
    %20 = arith.maximumf %18, %19 : vector<30x32xf32>
    %21 = vector.extract_strided_slice %20 {offsets = [0, 0], sizes = [28, 32], strides = [1, 1]} : vector<30x32xf32> to vector<28x32xf32>
    %c0_12 = arith.constant 0 : index
    %c0_13 = arith.constant 0 : index
    %22 = vector.load %arg10[%c0_12, %c0_13] : memref<28x96xf32, #tpu.memory_space<vmem>>, vector<28x32xf32>
    tpu.vector_store %arg10[%c0_12, %c0_13], %21 {strides = array<i32>} : memref<28x96xf32, #tpu.memory_space<vmem>>, vector<28x32xf32>,
    %23 = vector.extract_strided_slice %20 {offsets = [1, 0], sizes = [28, 32], strides = [1, 1]} : vector<30x32xf32> to vector<28x32xf32>
    %c0_14 = arith.constant 0 : index
    %c32 = arith.constant 32 : index
    %24 = vector.load %arg10[%c0_14, %c32] : memref<28x96xf32, #tpu.memory_space<vmem>>, vector<28x32xf32>
    tpu.vector_store %arg10[%c0_14, %c32], %23 {strides = array<i32>} : memref<28x96xf32, #tpu.memory_space<vmem>>, vector<28x32xf32>,
    %25 = vector.extract_strided_slice %20 {offsets = [2, 0], sizes = [28, 32], strides = [1, 1]} : vector<30x32xf32> to vector<28x32xf32>
    %c0_15 = arith.constant 0 : index
    %c64 = arith.constant 64 : index
    %26 = vector.load %arg10[%c0_15, %c64] : memref<28x96xf32, #tpu.memory_space<vmem>>, vector<28x32xf32>
    tpu.vector_store %arg10[%c0_15, %c64], %25 {strides = array<i32>} : memref<28x96xf32, #tpu.memory_space<vmem>>, vector<28x32xf32>,
    %c0_16 = arith.constant 0 : index
    %c0_17 = arith.constant 0 : index
    %27 = vector.load %arg10[%c0_16, %c0_17] : memref<28x96xf32, #tpu.memory_space<vmem>>, vector<28x96xf32>
    %c0_18 = arith.constant 0 : index
    %c0_19 = arith.constant 0 : index
    %28 = vector.load %arg3[%c0_18, %c0_19] : memref<96x32xf32, #tpu.memory_space<vmem>>, vector<96x32xf32>
    %cst_20 = arith.constant dense<0.000000e+00> : vector<28x32xf32>
    %29 = tpu.matmul %27, %28, %cst_20 {dimension_numbers = #tpu.dot_dimension_numbers<[1], [0], [0], [1], [0, 0, 1, 1], [], []>} : vector<28x96xf32>, vector<96x32xf32>, vector<28x32xf32> -> vector<28x32xf32>
    %c0_21 = arith.constant 0 : index
    %c0_22 = arith.constant 0 : index
    %30 = vector.load %arg4[%c0_21, %c0_22] : memref<1x32xf32, #tpu.memory_space<vmem>>, vector<1x32xf32>
    %31 = vector.broadcast %30 : vector<1x32xf32> to vector<28x32xf32>
    %32 = arith.addf %29, %31 : vector<28x32xf32>
    %cst_23 = arith.constant 0.000000e+00 : f32
    %33 = vector.broadcast %cst_23 : f32 to vector<28x32xf32>
    %34 = arith.maximumf %32, %33 : vector<28x32xf32>
    %35 = vector.extract_strided_slice %34 {offsets = [0, 0], sizes = [1, 32], strides = [1, 1]} : vector<28x32xf32> to vector<1x32xf32>
    %36 = vector.extract_strided_slice %34 {offsets = [1, 0], sizes = [1, 32], strides = [1, 1]} : vector<28x32xf32> to vector<1x32xf32>
    %37 = arith.maximumf %35, %36 : vector<1x32xf32>
    %38 = vector.extract_strided_slice %37 {offsets = [0, 0], sizes = [1, 16], strides = [1, 1]} : vector<1x32xf32> to vector<1x16xf32>
    %c0_24 = arith.constant 0 : index
    %c0_25 = arith.constant 0 : index
    %39 = vector.load %arg11[%c0_24, %c0_25] : memref<2x224xf32, #tpu.memory_space<vmem>>, vector<1x16xf32>
    tpu.vector_store %arg11[%c0_24, %c0_25], %38 {strides = array<i32>} : memref<2x224xf32, #tpu.memory_space<vmem>>, vector<1x16xf32>,
    %40 = vector.extract_strided_slice %37 {offsets = [0, 16], sizes = [1, 16], strides = [1, 1]} : vector<1x32xf32> to vector<1x16xf32>
    %c1_26 = arith.constant 1 : index
    %c0_27 = arith.constant 0 : index
    %41 = vector.load %arg11[%c1_26, %c0_27] : memref<2x224xf32, #tpu.memory_space<vmem>>, vector<1x16xf32>
    tpu.vector_store %arg11[%c1_26, %c0_27], %40 {strides = array<i32>} : memref<2x224xf32, #tpu.memory_space<vmem>>, vector<1x16xf32>,
    %42 = vector.extract_strided_slice %34 {offsets = [2, 0], sizes = [1, 32], strides = [1, 1]} : vector<28x32xf32> to vector<1x32xf32>
    %43 = vector.extract_strided_slice %34 {offsets = [3, 0], sizes = [1, 32], strides = [1, 1]} : vector<28x32xf32> to vector<1x32xf32>
    %44 = arith.maximumf %42, %43 : vector<1x32xf32>
    %45 = vector.extract_strided_slice %44 {offsets = [0, 0], sizes = [1, 16], strides = [1, 1]} : vector<1x32xf32> to vector<1x16xf32>
    %c0_28 = arith.constant 0 : index
    %c16 = arith.constant 16 : index
    %46 = vector.load %arg11[%c0_28, %c16] : memref<2x224xf32, #tpu.memory_space<vmem>>, vector<1x16xf32>
    tpu.vector_store %arg11[%c0_28, %c16], %45 {strides = array<i32>} : memref<2x224xf32, #tpu.memory_space<vmem>>, vector<1x16xf32>,
    %47 = vector.extract_strided_slice %44 {offsets = [0, 16], sizes = [1, 16], strides = [1, 1]} : vector<1x32xf32> to vector<1x16xf32>
    %c1_29 = arith.constant 1 : index
    %c16_30 = arith.constant 16 : index
    %48 = vector.load %arg11[%c1_29, %c16_30] : memref<2x224xf32, #tpu.memory_space<vmem>>, vector<1x16xf32>
    tpu.vector_store %arg11[%c1_29, %c16_30], %47 {strides = array<i32>} : memref<2x224xf32, #tpu.memory_space<vmem>>, vector<1x16xf32>,
    %49 = vector.extract_strided_slice %34 {offsets = [4, 0], sizes = [1, 32], strides = [1, 1]} : vector<28x32xf32> to vector<1x32xf32>
    %50 = vector.extract_strided_slice %34 {offsets = [5, 0], sizes = [1, 32], strides = [1, 1]} : vector<28x32xf32> to vector<1x32xf32>
    %51 = arith.maximumf %49, %50 : vector<1x32xf32>
    %52 = vector.extract_strided_slice %51 {offsets = [0, 0], sizes = [1, 16], strides = [1, 1]} : vector<1x32xf32> to vector<1x16xf32>
    %c0_31 = arith.constant 0 : index
    %c32_32 = arith.constant 32 : index
    %53 = vector.load %arg11[%c0_31, %c32_32] : memref<2x224xf32, #tpu.memory_space<vmem>>, vector<1x16xf32>
    tpu.vector_store %arg11[%c0_31, %c32_32], %52 {strides = array<i32>} : memref<2x224xf32, #tpu.memory_space<vmem>>, vector<1x16xf32>,
    %54 = vector.extract_strided_slice %51 {offsets = [0, 16], sizes = [1, 16], strides = [1, 1]} : vector<1x32xf32> to vector<1x16xf32>
    %c1_33 = arith.constant 1 : index
    %c32_34 = arith.constant 32 : index
    %55 = vector.load %arg11[%c1_33, %c32_34] : memref<2x224xf32, #tpu.memory_space<vmem>>, vector<1x16xf32>
    tpu.vector_store %arg11[%c1_33, %c32_34], %54 {strides = array<i32>} : memref<2x224xf32, #tpu.memory_space<vmem>>, vector<1x16xf32>,
    %56 = vector.extract_strided_slice %34 {offsets = [6, 0], sizes = [1, 32], strides = [1, 1]} : vector<28x32xf32> to vector<1x32xf32>
    %57 = vector.extract_strided_slice %34 {offsets = [7, 0], sizes = [1, 32], strides = [1, 1]} : vector<28x32xf32> to vector<1x32xf32>
    %58 = arith.maximumf %56, %57 : vector<1x32xf32>
    %59 = vector.extract_strided_slice %58 {offsets = [0, 0], sizes = [1, 16], strides = [1, 1]} : vector<1x32xf32> to vector<1x16xf32>
    %c0_35 = arith.constant 0 : index
    %c48 = arith.constant 48 : index
    %60 = vector.load %arg11[%c0_35, %c48] : memref<2x224xf32, #tpu.memory_space<vmem>>, vector<1x16xf32>
    tpu.vector_store %arg11[%c0_35, %c48], %59 {strides = array<i32>} : memref<2x224xf32, #tpu.memory_space<vmem>>, vector<1x16xf32>,
    %61 = vector.extract_strided_slice %58 {offsets = [0, 16], sizes = [1, 16], strides = [1, 1]} : vector<1x32xf32> to vector<1x16xf32>
    %c1_36 = arith.constant 1 : index
    %c48_37 = arith.constant 48 : index
    %62 = vector.load %arg11[%c1_36, %c48_37] : memref<2x224xf32, #tpu.memory_space<vmem>>, vector<1x16xf32>
    tpu.vector_store %arg11[%c1_36, %c48_37], %61 {strides = array<i32>} : memref<2x224xf32, #tpu.memory_space<vmem>>, vector<1x16xf32>,
    %63 = vector.extract_strided_slice %34 {offsets = [8, 0], sizes = [1, 32], strides = [1, 1]} : vector<28x32xf32> to vector<1x32xf32>
    %64 = vector.extract_strided_slice %34 {offsets = [9, 0], sizes = [1, 32], strides = [1, 1]} : vector<28x32xf32> to vector<1x32xf32>
    %65 = arith.maximumf %63, %64 : vector<1x32xf32>
    %66 = vector.extract_strided_slice %65 {offsets = [0, 0], sizes = [1, 16], strides = [1, 1]} : vector<1x32xf32> to vector<1x16xf32>
    %c0_38 = arith.constant 0 : index
    %c64_39 = arith.constant 64 : index
    %67 = vector.load %arg11[%c0_38, %c64_39] : memref<2x224xf32, #tpu.memory_space<vmem>>, vector<1x16xf32>
    tpu.vector_store %arg11[%c0_38, %c64_39], %66 {strides = array<i32>} : memref<2x224xf32, #tpu.memory_space<vmem>>, vector<1x16xf32>,
    %68 = vector.extract_strided_slice %65 {offsets = [0, 16], sizes = [1, 16], strides = [1, 1]} : vector<1x32xf32> to vector<1x16xf32>
    %c1_40 = arith.constant 1 : index
    %c64_41 = arith.constant 64 : index
    %69 = vector.load %arg11[%c1_40, %c64_41] : memref<2x224xf32, #tpu.memory_space<vmem>>, vector<1x16xf32>
    tpu.vector_store %arg11[%c1_40, %c64_41], %68 {strides = array<i32>} : memref<2x224xf32, #tpu.memory_space<vmem>>, vector<1x16xf32>,
    %70 = vector.extract_strided_slice %34 {offsets = [10, 0], sizes = [1, 32], strides = [1, 1]} : vector<28x32xf32> to vector<1x32xf32>
    %71 = vector.extract_strided_slice %34 {offsets = [11, 0], sizes = [1, 32], strides = [1, 1]} : vector<28x32xf32> to vector<1x32xf32>
    %72 = arith.maximumf %70, %71 : vector<1x32xf32>
    %73 = vector.extract_strided_slice %72 {offsets = [0, 0], sizes = [1, 16], strides = [1, 1]} : vector<1x32xf32> to vector<1x16xf32>
    %c0_42 = arith.constant 0 : index
    %c80 = arith.constant 80 : index
    %74 = vector.load %arg11[%c0_42, %c80] : memref<2x224xf32, #tpu.memory_space<vmem>>, vector<1x16xf32>
    tpu.vector_store %arg11[%c0_42, %c80], %73 {strides = array<i32>} : memref<2x224xf32, #tpu.memory_space<vmem>>, vector<1x16xf32>,
    %75 = vector.extract_strided_slice %72 {offsets = [0, 16], sizes = [1, 16], strides = [1, 1]} : vector<1x32xf32> to vector<1x16xf32>
    %c1_43 = arith.constant 1 : index
    %c80_44 = arith.constant 80 : index
    %76 = vector.load %arg11[%c1_43, %c80_44] : memref<2x224xf32, #tpu.memory_space<vmem>>, vector<1x16xf32>
    tpu.vector_store %arg11[%c1_43, %c80_44], %75 {strides = array<i32>} : memref<2x224xf32, #tpu.memory_space<vmem>>, vector<1x16xf32>,
    %77 = vector.extract_strided_slice %34 {offsets = [12, 0], sizes = [1, 32], strides = [1, 1]} : vector<28x32xf32> to vector<1x32xf32>
    %78 = vector.extract_strided_slice %34 {offsets = [13, 0], sizes = [1, 32], strides = [1, 1]} : vector<28x32xf32> to vector<1x32xf32>
    %79 = arith.maximumf %77, %78 : vector<1x32xf32>
    %80 = vector.extract_strided_slice %79 {offsets = [0, 0], sizes = [1, 16], strides = [1, 1]} : vector<1x32xf32> to vector<1x16xf32>
    %c0_45 = arith.constant 0 : index
    %c96 = arith.constant 96 : index
    %81 = vector.load %arg11[%c0_45, %c96] : memref<2x224xf32, #tpu.memory_space<vmem>>, vector<1x16xf32>
    tpu.vector_store %arg11[%c0_45, %c96], %80 {strides = array<i32>} : memref<2x224xf32, #tpu.memory_space<vmem>>, vector<1x16xf32>,
    %82 = vector.extract_strided_slice %79 {offsets = [0, 16], sizes = [1, 16], strides = [1, 1]} : vector<1x32xf32> to vector<1x16xf32>
    %c1_46 = arith.constant 1 : index
    %c96_47 = arith.constant 96 : index
    %83 = vector.load %arg11[%c1_46, %c96_47] : memref<2x224xf32, #tpu.memory_space<vmem>>, vector<1x16xf32>
    tpu.vector_store %arg11[%c1_46, %c96_47], %82 {strides = array<i32>} : memref<2x224xf32, #tpu.memory_space<vmem>>, vector<1x16xf32>,
    %84 = vector.extract_strided_slice %34 {offsets = [14, 0], sizes = [1, 32], strides = [1, 1]} : vector<28x32xf32> to vector<1x32xf32>
    %85 = vector.extract_strided_slice %34 {offsets = [15, 0], sizes = [1, 32], strides = [1, 1]} : vector<28x32xf32> to vector<1x32xf32>
    %86 = arith.maximumf %84, %85 : vector<1x32xf32>
    %87 = vector.extract_strided_slice %86 {offsets = [0, 0], sizes = [1, 16], strides = [1, 1]} : vector<1x32xf32> to vector<1x16xf32>
    %c0_48 = arith.constant 0 : index
    %c112 = arith.constant 112 : index
    %88 = vector.load %arg11[%c0_48, %c112] : memref<2x224xf32, #tpu.memory_space<vmem>>, vector<1x16xf32>
    tpu.vector_store %arg11[%c0_48, %c112], %87 {strides = array<i32>} : memref<2x224xf32, #tpu.memory_space<vmem>>, vector<1x16xf32>,
    %89 = vector.extract_strided_slice %86 {offsets = [0, 16], sizes = [1, 16], strides = [1, 1]} : vector<1x32xf32> to vector<1x16xf32>
    %c1_49 = arith.constant 1 : index
    %c112_50 = arith.constant 112 : index
    %90 = vector.load %arg11[%c1_49, %c112_50] : memref<2x224xf32, #tpu.memory_space<vmem>>, vector<1x16xf32>
    tpu.vector_store %arg11[%c1_49, %c112_50], %89 {strides = array<i32>} : memref<2x224xf32, #tpu.memory_space<vmem>>, vector<1x16xf32>,
    %91 = vector.extract_strided_slice %34 {offsets = [16, 0], sizes = [1, 32], strides = [1, 1]} : vector<28x32xf32> to vector<1x32xf32>
    %92 = vector.extract_strided_slice %34 {offsets = [17, 0], sizes = [1, 32], strides = [1, 1]} : vector<28x32xf32> to vector<1x32xf32>
    %93 = arith.maximumf %91, %92 : vector<1x32xf32>
    %94 = vector.extract_strided_slice %93 {offsets = [0, 0], sizes = [1, 16], strides = [1, 1]} : vector<1x32xf32> to vector<1x16xf32>
    %c0_51 = arith.constant 0 : index
    %c128 = arith.constant 128 : index
    %95 = vector.load %arg11[%c0_51, %c128] : memref<2x224xf32, #tpu.memory_space<vmem>>, vector<1x16xf32>
    tpu.vector_store %arg11[%c0_51, %c128], %94 {strides = array<i32>} : memref<2x224xf32, #tpu.memory_space<vmem>>, vector<1x16xf32>,
    %96 = vector.extract_strided_slice %93 {offsets = [0, 16], sizes = [1, 16], strides = [1, 1]} : vector<1x32xf32> to vector<1x16xf32>
    %c1_52 = arith.constant 1 : index
    %c128_53 = arith.constant 128 : index
    %97 = vector.load %arg11[%c1_52, %c128_53] : memref<2x224xf32, #tpu.memory_space<vmem>>, vector<1x16xf32>
    tpu.vector_store %arg11[%c1_52, %c128_53], %96 {strides = array<i32>} : memref<2x224xf32, #tpu.memory_space<vmem>>, vector<1x16xf32>,
    %98 = vector.extract_strided_slice %34 {offsets = [18, 0], sizes = [1, 32], strides = [1, 1]} : vector<28x32xf32> to vector<1x32xf32>
    %99 = vector.extract_strided_slice %34 {offsets = [19, 0], sizes = [1, 32], strides = [1, 1]} : vector<28x32xf32> to vector<1x32xf32>
    %100 = arith.maximumf %98, %99 : vector<1x32xf32>
    %101 = vector.extract_strided_slice %100 {offsets = [0, 0], sizes = [1, 16], strides = [1, 1]} : vector<1x32xf32> to vector<1x16xf32>
    %c0_54 = arith.constant 0 : index
    %c144 = arith.constant 144 : index
    %102 = vector.load %arg11[%c0_54, %c144] : memref<2x224xf32, #tpu.memory_space<vmem>>, vector<1x16xf32>
    tpu.vector_store %arg11[%c0_54, %c144], %101 {strides = array<i32>} : memref<2x224xf32, #tpu.memory_space<vmem>>, vector<1x16xf32>,
    %103 = vector.extract_strided_slice %100 {offsets = [0, 16], sizes = [1, 16], strides = [1, 1]} : vector<1x32xf32> to vector<1x16xf32>
    %c1_55 = arith.constant 1 : index
    %c144_56 = arith.constant 144 : index
    %104 = vector.load %arg11[%c1_55, %c144_56] : memref<2x224xf32, #tpu.memory_space<vmem>>, vector<1x16xf32>
    tpu.vector_store %arg11[%c1_55, %c144_56], %103 {strides = array<i32>} : memref<2x224xf32, #tpu.memory_space<vmem>>, vector<1x16xf32>,
    %105 = vector.extract_strided_slice %34 {offsets = [20, 0], sizes = [1, 32], strides = [1, 1]} : vector<28x32xf32> to vector<1x32xf32>
    %106 = vector.extract_strided_slice %34 {offsets = [21, 0], sizes = [1, 32], strides = [1, 1]} : vector<28x32xf32> to vector<1x32xf32>
    %107 = arith.maximumf %105, %106 : vector<1x32xf32>
    %108 = vector.extract_strided_slice %107 {offsets = [0, 0], sizes = [1, 16], strides = [1, 1]} : vector<1x32xf32> to vector<1x16xf32>
    %c0_57 = arith.constant 0 : index
    %c160 = arith.constant 160 : index
    %109 = vector.load %arg11[%c0_57, %c160] : memref<2x224xf32, #tpu.memory_space<vmem>>, vector<1x16xf32>
    tpu.vector_store %arg11[%c0_57, %c160], %108 {strides = array<i32>} : memref<2x224xf32, #tpu.memory_space<vmem>>, vector<1x16xf32>,
    %110 = vector.extract_strided_slice %107 {offsets = [0, 16], sizes = [1, 16], strides = [1, 1]} : vector<1x32xf32> to vector<1x16xf32>
    %c1_58 = arith.constant 1 : index
    %c160_59 = arith.constant 160 : index
    %111 = vector.load %arg11[%c1_58, %c160_59] : memref<2x224xf32, #tpu.memory_space<vmem>>, vector<1x16xf32>
    tpu.vector_store %arg11[%c1_58, %c160_59], %110 {strides = array<i32>} : memref<2x224xf32, #tpu.memory_space<vmem>>, vector<1x16xf32>,
    %112 = vector.extract_strided_slice %34 {offsets = [22, 0], sizes = [1, 32], strides = [1, 1]} : vector<28x32xf32> to vector<1x32xf32>
    %113 = vector.extract_strided_slice %34 {offsets = [23, 0], sizes = [1, 32], strides = [1, 1]} : vector<28x32xf32> to vector<1x32xf32>
    %114 = arith.maximumf %112, %113 : vector<1x32xf32>
    %115 = vector.extract_strided_slice %114 {offsets = [0, 0], sizes = [1, 16], strides = [1, 1]} : vector<1x32xf32> to vector<1x16xf32>
    %c0_60 = arith.constant 0 : index
    %c176 = arith.constant 176 : index
    %116 = vector.load %arg11[%c0_60, %c176] : memref<2x224xf32, #tpu.memory_space<vmem>>, vector<1x16xf32>
    tpu.vector_store %arg11[%c0_60, %c176], %115 {strides = array<i32>} : memref<2x224xf32, #tpu.memory_space<vmem>>, vector<1x16xf32>,
    %117 = vector.extract_strided_slice %114 {offsets = [0, 16], sizes = [1, 16], strides = [1, 1]} : vector<1x32xf32> to vector<1x16xf32>
    %c1_61 = arith.constant 1 : index
    %c176_62 = arith.constant 176 : index
    %118 = vector.load %arg11[%c1_61, %c176_62] : memref<2x224xf32, #tpu.memory_space<vmem>>, vector<1x16xf32>
    tpu.vector_store %arg11[%c1_61, %c176_62], %117 {strides = array<i32>} : memref<2x224xf32, #tpu.memory_space<vmem>>, vector<1x16xf32>,
    %119 = vector.extract_strided_slice %34 {offsets = [24, 0], sizes = [1, 32], strides = [1, 1]} : vector<28x32xf32> to vector<1x32xf32>
    %120 = vector.extract_strided_slice %34 {offsets = [25, 0], sizes = [1, 32], strides = [1, 1]} : vector<28x32xf32> to vector<1x32xf32>
    %121 = arith.maximumf %119, %120 : vector<1x32xf32>
    %122 = vector.extract_strided_slice %121 {offsets = [0, 0], sizes = [1, 16], strides = [1, 1]} : vector<1x32xf32> to vector<1x16xf32>
    %c0_63 = arith.constant 0 : index
    %c192 = arith.constant 192 : index
    %123 = vector.load %arg11[%c0_63, %c192] : memref<2x224xf32, #tpu.memory_space<vmem>>, vector<1x16xf32>
    tpu.vector_store %arg11[%c0_63, %c192], %122 {strides = array<i32>} : memref<2x224xf32, #tpu.memory_space<vmem>>, vector<1x16xf32>,
    %124 = vector.extract_strided_slice %121 {offsets = [0, 16], sizes = [1, 16], strides = [1, 1]} : vector<1x32xf32> to vector<1x16xf32>
    %c1_64 = arith.constant 1 : index
    %c192_65 = arith.constant 192 : index
    %125 = vector.load %arg11[%c1_64, %c192_65] : memref<2x224xf32, #tpu.memory_space<vmem>>, vector<1x16xf32>
    tpu.vector_store %arg11[%c1_64, %c192_65], %124 {strides = array<i32>} : memref<2x224xf32, #tpu.memory_space<vmem>>, vector<1x16xf32>,
    %126 = vector.extract_strided_slice %34 {offsets = [26, 0], sizes = [1, 32], strides = [1, 1]} : vector<28x32xf32> to vector<1x32xf32>
    %127 = vector.extract_strided_slice %34 {offsets = [27, 0], sizes = [1, 32], strides = [1, 1]} : vector<28x32xf32> to vector<1x32xf32>
    %128 = arith.maximumf %126, %127 : vector<1x32xf32>
    %129 = vector.extract_strided_slice %128 {offsets = [0, 0], sizes = [1, 16], strides = [1, 1]} : vector<1x32xf32> to vector<1x16xf32>
    %c0_66 = arith.constant 0 : index
    %c208 = arith.constant 208 : index
    %130 = vector.load %arg11[%c0_66, %c208] : memref<2x224xf32, #tpu.memory_space<vmem>>, vector<1x16xf32>
    tpu.vector_store %arg11[%c0_66, %c208], %129 {strides = array<i32>} : memref<2x224xf32, #tpu.memory_space<vmem>>, vector<1x16xf32>,
    %131 = vector.extract_strided_slice %128 {offsets = [0, 16], sizes = [1, 16], strides = [1, 1]} : vector<1x32xf32> to vector<1x16xf32>
    %c1_67 = arith.constant 1 : index
    %c208_68 = arith.constant 208 : index
    %132 = vector.load %arg11[%c1_67, %c208_68] : memref<2x224xf32, #tpu.memory_space<vmem>>, vector<1x16xf32>
    tpu.vector_store %arg11[%c1_67, %c208_68], %131 {strides = array<i32>} : memref<2x224xf32, #tpu.memory_space<vmem>>, vector<1x16xf32>,
    %c0_69 = arith.constant 0 : index
    %c0_70 = arith.constant 0 : index
    %133 = vector.load %arg11[%c0_69, %c0_70] : memref<2x224xf32, #tpu.memory_space<vmem>>, vector<2x224xf32>
    %c0_71 = arith.constant 0 : index
    %c0_72 = arith.constant 0 : index
    %134 = vector.load %arg5[%c0_71, %c0_72] : memref<224x32xf32, #tpu.memory_space<vmem>>, vector<224x32xf32>
    %cst_73 = arith.constant dense<0.000000e+00> : vector<2x32xf32>
    %135 = tpu.matmul %133, %134, %cst_73 {dimension_numbers = #tpu.dot_dimension_numbers<[1], [0], [0], [1], [0, 0, 1, 1], [], []>} : vector<2x224xf32>, vector<224x32xf32>, vector<2x32xf32> -> vector<2x32xf32>
    %c0_74 = arith.constant 0 : index
    %c0_75 = arith.constant 0 : index
    %136 = vector.load %arg6[%c0_74, %c0_75] : memref<1x32xf32, #tpu.memory_space<vmem>>, vector<1x32xf32>
    %137 = vector.broadcast %136 : vector<1x32xf32> to vector<2x32xf32>
    %138 = arith.addf %135, %137 : vector<2x32xf32>
    %cst_76 = arith.constant 0.000000e+00 : f32
    %139 = vector.broadcast %cst_76 : f32 to vector<2x32xf32>
    %140 = arith.maximumf %138, %139 : vector<2x32xf32>
    %c0_77 = arith.constant 0 : index
    %c0_78 = arith.constant 0 : index
    %141 = vector.load %arg7[%c0_77, %c0_78] : memref<32x128xf32, #tpu.memory_space<vmem>>, vector<32x128xf32>
    %cst_79 = arith.constant dense<0.000000e+00> : vector<2x128xf32>
    %142 = tpu.matmul %140, %141, %cst_79 {dimension_numbers = #tpu.dot_dimension_numbers<[1], [0], [0], [1], [0, 0, 1, 1], [], []>} : vector<2x32xf32>, vector<32x128xf32>, vector<2x128xf32> -> vector<2x128xf32>
    %c0_80 = arith.constant 0 : index
    %c0_81 = arith.constant 0 : index
    %143 = vector.load %arg8[%c0_80, %c0_81] : memref<1x128xf32, #tpu.memory_space<vmem>>, vector<1x128xf32>
    %144 = vector.broadcast %143 : vector<1x128xf32> to vector<2x128xf32>
    %145 = arith.addf %142, %144 : vector<2x128xf32>
    %cst_82 = arith.constant 0.000000e+00 : f32
    %146 = vector.broadcast %cst_82 : f32 to vector<2x128xf32>
    %147 = arith.subf %146, %145 : vector<2x128xf32>
    %148 = math.exp %147 : vector<2x128xf32>
    %cst_83 = arith.constant 1.000000e+00 : f32
    %149 = vector.broadcast %cst_83 : f32 to vector<2x128xf32>
    %150 = arith.addf %149, %148 : vector<2x128xf32>
    %151 = tpu.reciprocal %150 {approx = true} : vector<2x128xf32> -> vector<2x128xf32>
    %c0_84 = arith.constant 0 : index
    %c0_85 = arith.constant 0 : index
    %152 = vector.load %arg9[%c0_84, %c0_85] : memref<2x128xf32, #tpu.memory_space<vmem>>, vector<2x128xf32>
    tpu.vector_store %arg9[%c0_84, %c0_85], %151 {strides = array<i32>} : memref<2x128xf32, #tpu.memory_space<vmem>>, vector<2x128xf32>,
    return
  }
}

</mosaic_0001>

<bundles_post_ra>
// kernel: tile.17
= control target key start
LH: loop header
LB: loop body
LE: loop exit
PB: predicated region body
PF: predicated region fallthrough
CT: control target
= control target key end

     0   :  { %vm16_vm0 = vcmask 130048   ;;  %vm22_vm1 = vcmask 261248   ;;  %s57_s0 = inlined_call_operand.vmem [shape: f32[3,2,16], index: 0, kind: input, shape index: {}]   ;;  %s58_s1 = inlined_call_operand.vmem [shape: f32[3,32], index: 1, kind: output, shape index: {}]  }
   0x1   :  { %v31_v0 = vld [vmem:[%s57_s0 + $0x4] sm:$0x3]  ;;  %v32_v1 = vld [vmem:[%s57_s0 + $0x2] sm:$0x3]  ;;  %v13_v2 = vld [vmem:[%s57_s0] sm:$0x3] }
   0x2   :  { %8 = vst [vmem:[#allocation1 + $0x10] sm:$0x3] %v31_v0  ;;  %12 = vst [vmem:[#allocation1 + $0x8] sm:$0x3] %v32_v1  ;;  %s34_s0 = smov 16  }
   0x3   :  { %14 = vst [vmem:[#allocation1] sm:$0x3] %v13_v2 }
   0xa   :  { %v19_v3 = vld [vmem:[#allocation1 + $0x1] ss:$8 sm:$0x7]   ;;  %v15_v4 = vld [vmem:[#allocation1] ss:$8 sm:$0x7]  }
   0xb   :  { %20 = vrot.lane.b32.xlu0 %v19_v3, %s34_s0  ;;  %17 = vst.msk [vmem:[#allocation0] sm:$0x7] %vm16_vm0, %v15_v4  }
  0x7d   :  { %v21_v5 = vpop.permute.xlu0 %20  }
  0x7e   :  { %23 = vst.msk [vmem:[#allocation0] sm:$0x7] %vm22_vm1, %v21_v5  }
  0x85   :  { %v27_v6 = vld [vmem:[#allocation0] sm:$0xf] }
  0x86   :  { %29 = vst [vmem:[%s58_s1] sm:$0xf] %v27_v6 }

// kernel: cnn_forward.1
= control target key start
LH: loop header
LB: loop body
LE: loop exit
PB: predicated region body
PF: predicated region fallthrough
CT: control target
= control target key end

     0   :  { %vm96_vm0 = vcmask 261120   ;;  %s1230_s0 = inlined_call_operand.vmem [shape: f32[32,32], index: 0, kind: input, shape index: {}]   ;;  %s1231_s1 = inlined_call_operand.vmem [shape: f32[3,32], index: 1, kind: input, shape index: {}]   ;;  %s1232_s2 = inlined_call_operand.vmem [shape: f32[1,32], index: 2, kind: input, shape index: {}]   ;;  %s1233_s3 = inlined_call_operand.vmem [shape: f32[96,32], index: 3, kind: input, shape index: {}]   ;;  %s1234_s4 = inlined_call_operand.vmem [shape: f32[1,32], index: 4, kind: input, shape index: {}]   ;;  %s1235_s5 = inlined_call_operand.vmem [shape: f32[224,32], index: 5, kind: input, shape index: {}]   ;;  %s1236_s6 = inlined_call_operand.vmem [shape: f32[1,32], index: 6, kind: input, shape index: {}]   ;;  %s1237_s7 = inlined_call_operand.vmem [shape: f32[32,128], index: 7, kind: input, shape index: {}]   ;;  %s1238_s8 = inlined_call_operand.vmem [shape: f32[1,128], index: 8, kind: input, shape index: {}]   ;;  %s1239_s9 = inlined_call_operand.hbm [shape: f32[2,128], index: 9, kind: output, shape index: {}]  }
   0x1   :  { %v681_v0 = vld [vmem:[%s1232_s2] ss:$0 sm:$0xff]  ;;  %v43_v1 = vld [vmem:[%s1230_s0 + $0x10] sm:$0xff]  ;;  %v683_v5 = vld [vmem:[%s1231_s1 + $0x1] ss:$0 sm:$0xff] }
   0x2   :  { %v682_v2 = vld [vmem:[%s1231_s1] ss:$0 sm:$0xff]  ;;  %v60_v4 = vld [vmem:[%s1230_s0 + $0x11] sm:$0xff]  ;;  %v684_v8 = vld [vmem:[%s1231_s1 + $0x2] ss:$0 sm:$0xff] }
   0x3   :  { %v52_v3 = vmul.f32 %v682_v2, %v43_v1  ;;  %v77_v6 = vld [vmem:[%s1230_s0 + $0x12] sm:$0xff]  ;;  %v69_v7 = vmul.f32 %v683_v5, %v60_v4  ;;  %v41_v9 = vld [vmem:[%s1230_s0] sm:$0xff]  ;;  %v42_v16 = vld [vmem:[%s1230_s0 + $0x8] sm:$0xff] }
   0x4   :  { %v58_v10 = vld [vmem:[%s1230_s0 + $0x1] sm:$0xff]  ;;  %v86_v12 = vmul.f32 %v684_v8, %v77_v6  ;;  %v50_v13 = vmul.f32 %v682_v2, %v41_v9  ;;  %v59_v17 = vld [vmem:[%s1230_s0 + $0x9] sm:$0xff]  ;;  %v51_v19 = vmul.f32 %v682_v2, %v42_v16  ;;  %v44_v22 = vld [vmem:[%s1230_s0 + $0x18] sm:$0x3f] }
   0x5   :  { %v56_v11 = vadd.f32 %v681_v0, %v52_v3  ;;  %v67_v14 = vmul.f32 %v683_v5, %v58_v10  ;;  %v75_v15 = vld [vmem:[%s1230_s0 + $0x2] sm:$0xff]  ;;  %v68_v20 = vmul.f32 %v683_v5, %v59_v17  ;;  %v76_v21 = vld [vmem:[%s1230_s0 + $0xa] sm:$0xff]  ;;  %v61_v23 = vld [vmem:[%s1230_s0 + $0x19] sm:$0x3f]  ;;  %v53_v27 = vmul.f32 %v682_v2, %v44_v22 }
   0x6   :  { %v84_v18 = vmul.f32 %v684_v8, %v75_v15  ;;  %v54_v25 = vadd.f32 %v681_v0, %v50_v13  ;;  %v85_v26 = vmul.f32 %v684_v8, %v76_v21  ;;  %v78_v28 = vld [vmem:[%s1230_s0 + $0x1a] sm:$0x3f]  ;;  %v148_v29 = vld [vmem:[%s1233_s3] sm:$0xff]  ;;  %v149_v30 = vld [vmem:[%s1233_s3 + $0x8] sm:$0xff]  ;;  %v55_v31 = vadd.f32 %v681_v0, %v51_v19 }
   0x7   :  { %v73_v24 = vadd.f32 %v69_v7, %v56_v11  ;;  %v70_v32 = vmul.f32 %v683_v5, %v61_v23  ;;  %v87_v33 = vmul.f32 %v684_v8, %v78_v28  ;;  %v757_v34 = vpack.c.bf16 %v149_v30, %v148_v29  ;;  %v150_v35 = vld [vmem:[%s1233_s3 + $0x10] sm:$0xff]  ;;  %v151_v36 = vld [vmem:[%s1233_s3 + $0x18] sm:$0xff]  ;;  %v152_v41 = vld [vmem:[%s1233_s3 + $0x20] sm:$0xff] }
   0x8   :  { %v71_v38 = vadd.f32 %v67_v14, %v54_v25  ;;  %v57_v39 = vadd.f32 %v681_v0, %v53_v27  ;;  %v761_v40 = vpack.c.bf16 %v151_v36, %v150_v35  ;;  %v153_v42 = vld [vmem:[%s1233_s3 + $0x28] sm:$0xff]  ;;  %v72_v43 = vadd.f32 %v68_v20, %v55_v31 }
   0x9   :  { %v90_v37 = vadd.f32 %v86_v12, %v73_v24  ;;  %758 = vmatprep.subr.bf16.mxu0 %v757_v34 }
   0xa   :  { %14 = vsyncpa [#allocation5], 0  ;;  %v88_v45 = vadd.f32 %v84_v18, %v71_v38  ;;  %v74_v46 = vadd.f32 %v70_v32, %v57_v39  ;;  %760 = vmatpush3.bf16.msra.mxu0 %v757_v34  ;;  %v89_v47 = vadd.f32 %v85_v26, %v72_v43  ;;  %v765_v48 = vpack.c.bf16 %v153_v42, %v152_v41  ;;  %s869_s28 = smov 32   ;;  %v154_v51 = vld [vmem:[%s1233_s3 + $0x30] sm:$0xff]  ;;  %v155_v52 = vld [vmem:[%s1233_s3 + $0x38] sm:$0xff]  ;;  %s870_s11 = smov 64  }
   0xb   :  { %v94_v44 = vmax.f32 %v90_v37, 0.0  ;;  %762 = vmatprep.subr.bf16.mxu0 %v761_v40  ;;  %vm100_vm1 = vcmask 257024   ;;  %v769_v55 = vpack.c.bf16 %v155_v52, %v154_v51  ;;  %v156_v56 = vld [vmem:[%s1233_s3 + $0x40] sm:$0xff]  ;;  %v157_v57 = vld [vmem:[%s1233_s3 + $0x48] sm:$0xff]  ;;  %v158_v59 = vld [vmem:[%s1233_s3 + $0x50] sm:$0xff]  ;;  %vm120_vm2 = vcmask 523520  }
   0xc   :  { %v92_v49 = vmax.f32 %v88_v45, 0.0  ;;  %v91_v50 = vadd.f32 %v87_v33, %v74_v46  ;;  %v93_v53 = vmax.f32 %v89_v47, 0.0  ;;  %v773_v58 = vpack.c.bf16 %v157_v57, %v156_v56  ;;  %v159_v60 = vld [vmem:[%s1233_s3 + $0x58] sm:$0xff]  ;;  %v459_v11 = vld [vmem:[%s1235_s5] sm:$0xff]  ;;  %v460_v12 = vld [vmem:[%s1235_s5 + $0x8] sm:$0xff]  ;;  %s873_s14 = smov 48  }
   0xd   :  { %110 = vrot.lane.b32.xlu1 %v94_v44, %s869_s28  ;;  %99 = vst.msk [vmem:[#allocation2 + $0x10] sm:$0xff] %vm96_vm0, %v94_v44  ;;  %v777_v61 = vpack.c.bf16 %v159_v60, %v158_v59  ;;  %vm118_vm3 = vcmask 523521   ;;  %vm137_vm4 = vcmask 785922   ;;  %vm139_vm5 = vcmask 785920   ;;  %v685_v17 = vld [vmem:[%s1234_s4] ss:$0 sm:$0xff] }
   0xe   :  { %106 = vrot.lane.b32.xlu0 %v92_v49, %s869_s28  ;;  %v95_v54 = vmax.f32 %v91_v50, 0.0  ;;  %764 = vmatpush3.bf16.msra.mxu0 %v761_v40  ;;  %97 = vst.msk [vmem:[#allocation2] sm:$0xff] %vm96_vm0, %v92_v49  ;;  %98 = vst.msk [vmem:[#allocation2 + $0x8] sm:$0xff] %vm96_vm0, %v93_v53  ;;  %vm123_vm6 = vcmask 520448   ;;  %vm142_vm7 = vcmask 783872   ;;  %vm167_vm8 = vcmask 785408  }
   0xf   :  { %766 = vmatprep.subr.bf16.mxu0 %v765_v48  ;;  %v871_v10 = vmov 0.0|0.0   ;;  %v782_v13 = vpack.c.bf16 %v460_v12, %v459_v11  ;;  %v872_v14 = vmov 1983009808   ;;  %v279_v16 = vlaneseq  ;;  %v461_v18 = vld [vmem:[%s1235_s5 + $0x10] sm:$0xff]  ;;  %v462_v19 = vld [vmem:[%s1235_s5 + $0x18] sm:$0xff]  ;;  %v463_v28 = vld [vmem:[%s1235_s5 + $0x20] sm:$0xff] }
  0x10   :  { %101 = vst.msk [vmem:[#allocation2 + $0x18] sm:$0xf] %vm100_vm1, %v95_v54  ;;  %781 = vmatprep.subr.bf16.mxu1 %v871_v10  ;;  %v277_v15 = vunpack.c.l.s4 %v872_v14  ;;  %v785_v21 = vpack.c.bf16 %v462_v19, %v461_v18  ;;  %v464_v29 = vld [vmem:[%s1235_s5 + $0x28] sm:$0xff]  ;;  %vm273_vm9 = vcmask 122880   ;;  %v465_v39 = vld [vmem:[%s1235_s5 + $0x30] sm:$0xff]  ;;  %v466_v40 = vld [vmem:[%s1235_s5 + $0x38] sm:$0xff] }
  0x11   :  { %125 = vrot.lane.b32.xlu1 %v92_v49, %s870_s11  ;;  %783 = vmatpush1.bf16.msra.mxu1 %v782_v13  ;;  %v280_v25 = vshrl.u32 %v279_v16, 7  ;;  %v788_v31 = vpack.c.bf16 %v464_v29, %v463_v28  ;;  %v791_v42 = vpack.c.bf16 %v466_v40, %v465_v39  ;;  %v467_v46 = vld [vmem:[%s1235_s5 + $0x40] sm:$0xff]  ;;  %v468_v47 = vld [vmem:[%s1235_s5 + $0x48] sm:$0xff]  ;;  %s874_s19 = smov 112   ;;  %s875_s22 = smov 80   ;;  %v477_v11 = vld [vmem:[%s1235_s5 + $0x90] sm:$0xff] }
  0x12   :  { %108 = vrot.lane.b32.xlu0 %v93_v53, %s869_s28  ;;  %768 = vmatpush3.bf16.msra.mxu0 %v765_v48  ;;  %v278_v24 = vunpack.c.0.s8 %v277_v15  ;;  %v794_v49 = vpack.c.bf16 %v468_v47, %v467_v46  ;;  %v471_v59 = vld [vmem:[%s1235_s5 + $0x60] sm:$0xff]  ;;  %v472_v60 = vld [vmem:[%s1235_s5 + $0x68] sm:$0xff]  ;;  %s876_s26 = smov 96   ;;  %s877_s4 = smov 16   ;;  %v478_v12 = vld [vmem:[%s1235_s5 + $0x98] sm:$0xff]  ;;  %vm291_vm10 = vcmask 254080  }
  0x13   :  { %770 = vmatprep.subr.bf16.mxu0 %v769_v55  ;;  %784 = vmatprep.subr.bf16.mxu1 %v871_v10  ;;  %v809_v13 = vpack.c.bf16 %v478_v12, %v477_v11  ;;  %v479_v15 = vld [vmem:[%s1235_s5 + $0xa0] sm:$0xff]  ;;  %v480_v16 = vld [vmem:[%s1235_s5 + $0xa8] sm:$0xff]  ;;  %v485_v28 = vld [vmem:[%s1235_s5 + $0xd0] sm:$0xff]  ;;  %vm306_vm11 = vcmask 385280   ;;  %vm316_vm12 = vcmask 516480   ;;  %vm337_vm13 = vcmask 647680  }
  0x14   :  { %v1055_v33 = vsub.s32 %v278_v24, %v280_v25  ;;  %v483_v25 = vld [vmem:[%s1235_s5 + $0xc0] sm:$0xff]  ;;  %v486_v29 = vld [vmem:[%s1235_s5 + $0xd8] sm:$0xff]  ;;  %vm347_vm14 = vcmask 778880   ;;  %vm364_vm15 = vcmask 910080   ;;  %vm374_vm1 = vcmask 1041280  }
  0x15   :  { %129 = vrot.lane.b32.xlu1 %v94_v44, %s870_s11  ;;  %786 = vmatpush1.bf16.msra.mxu1 %v785_v21  ;;  %v482_v21 = vld [vmem:[%s1235_s5 + $0xb8] sm:$0xff] }
  0x16   :  { %127 = vrot.lane.b32.xlu0 %v93_v53, %s870_s11  ;;  %772 = vmatpush3.bf16.msra.mxu0 %v769_v55  ;;  %v470_v55 = vld [vmem:[%s1235_s5 + $0x58] sm:$0xff] }
  0x17   :  { %774 = vmatprep.subr.bf16.mxu0 %v773_v58  ;;  %787 = vmatprep.subr.bf16.mxu1 %v871_v10 }
  0x19   :  { %131 = vrot.lane.b32.xlu1 %v95_v54, %s870_s11  ;;  %789 = vmatpush1.bf16.msra.mxu1 %v788_v31  ;;  %v821_v31 = vpack.c.bf16 %v486_v29, %v485_v28 }
  0x1a   :  { %112 = vrot.lane.b32.xlu0 %v95_v54, %s869_s28  ;;  %776 = vmatpush3.bf16.msra.mxu0 %v773_v58  ;;  %v469_v54 = vld [vmem:[%s1235_s5 + $0x50] sm:$0xff] }
  0x1b   :  { %778 = vmatprep.subr.bf16.mxu0 %v777_v61  ;;  %790 = vmatprep.subr.bf16.mxu1 %v871_v10  ;;  %v797_v56 = vpack.c.bf16 %v470_v55, %v469_v54 }
  0x1d   :  { %792 = vmatpush1.bf16.msra.mxu1 %v791_v42 }
  0x1e   :  { %780 = vmatpush3.bf16.msra.mxu0 %v777_v61  ;;  %793 = vmatprep.subr.bf16.mxu1 %v871_v10  ;;  %v800_v61 = vpack.c.bf16 %v472_v60, %v471_v59 }
  0x1f   :  { %823 = vmatprep.subr.bf16.mxu0 %v871_v10 }
  0x21   :  { %795 = vmatpush1.bf16.msra.mxu1 %v794_v49 }
  0x22   :  { %796 = vmatprep.subr.bf16.mxu1 %v871_v10 }
  0x25   :  { %798 = vmatpush1.bf16.msra.mxu1 %v797_v56 }
  0x26   :  { %799 = vmatprep.subr.bf16.mxu1 %v871_v10 }
  0x29   :  { %801 = vmatpush1.bf16.msra.mxu1 %v800_v61 }
  0x2a   :  { %802 = vmatprep.subr.bf16.mxu1 %v871_v10 }
  0x7f   :  { %v111_v62 = vpop.permute.xlu1 %110 }
  0x80   :  { %122 = vst.msk [vmem:[#allocation2 + $0xf] sm:$0xff] %vm120_vm2, %v111_v62  ;;  %v107_v63 = vpop.permute.xlu0 %106 }
  0x81   :  { %119 = vst.msk [vmem:[#allocation2 - $0x1] sm:$0xfe] %vm118_vm3, %v107_v63 }
  0x83   :  { %v126_v0 = vpop.permute.xlu1 %125 }
  0x84   :  { %138 = vst.msk [vmem:[#allocation2 - $0x2] sm:$0xfc] %vm137_vm4, %v126_v0  ;;  %v109_v1 = vpop.permute.xlu0 %108 }
  0x85   :  { %121 = vst.msk [vmem:[#allocation2 + $0x7] sm:$0xff] %vm120_vm2, %v109_v1  ;;  %v473_v1 = vld [vmem:[%s1235_s5 + $0x70] sm:$0xff]  ;;  %vm878_vm2 = vmmov 0  }
  0x87   :  { %v130_v2 = vpop.permute.xlu1 %129 }
  0x88   :  { %141 = vst.msk [vmem:[#allocation2 + $0xe] sm:$0xff] %vm139_vm5, %v130_v2  ;;  %v128_v3 = vpop.permute.xlu0 %127  ;;  %v474_v2 = vld [vmem:[%s1235_s5 + $0x78] sm:$0xff] }
  0x89   :  { %140 = vst.msk [vmem:[#allocation2 + $0x6] sm:$0xff] %vm139_vm5, %v128_v3  ;;  %v803_v3 = vpack.c.bf16 %v474_v2, %v473_v1  ;;  %v879_v1 = vmov 0.0   ;;  %v690_v2 = vld [vmem:[%s1236_s6] ss:$0 sm:$0xff]  ;;  %s880_s6 = smov [#allocation4]  }
  0x8b   :  { %v132_v4 = vpop.permute.xlu1 %131  ;;  %804 = vmatpush1.bf16.msra.mxu1 %v803_v3 }
  0x8c   :  { %v113_v5 = vpop.permute.xlu0 %112  ;;  %805 = vmatprep.subr.bf16.mxu1 %v871_v10 }
  0x8d   :  { %124 = vst.msk [vmem:[#allocation2 + $0x17] sm:$0x1f] %vm123_vm6, %v113_v5 }
  0x8e   :  { %143 = vst.msk [vmem:[#allocation2 + $0x16] sm:$0x3f] %vm142_vm7, %v132_v4 }
  0x90   :  { %v144_v6 = vld [vmem:[#allocation2] sm:$0xff]  ;;  %v145_v7 = vld [vmem:[#allocation2 + $0x8] sm:$0xff] }
  0x91   :  { %740 = vmatprep.mubr.msk.f32.mxu0 %vm167_vm8, %v144_v6  ;;  %v475_v6 = vld [vmem:[%s1235_s5 + $0x80] sm:$0xff] }
  0x92   :  { %741 = vmatmul.mubr.msk.f32.vlgmr.msra.gmra.mrb[0].mxu0 %vm167_vm8, %v145_v7  ;;  %v476_v7 = vld [vmem:[%s1235_s5 + $0x88] sm:$0xff] }
  0x95   :  { %v146_v8 = vld [vmem:[#allocation2 + $0x10] sm:$0xff]  ;;  %v147_v9 = vld [vmem:[#allocation2 + $0x18] sm:$0xf] }
  0x96   :  { %743 = vmatprep.mubr.msk.f32.mxu0 %vm167_vm8, %v146_v8  ;;  %v806_v8 = vpack.c.bf16 %v476_v7, %v475_v6  ;;  %v693_v7 = vld [vmem:[%s1238_s8] ss:$0 sm:$0xff] }
  0x97   :  { %744 = vmatmul.mubr.msk.f32.gmra.mrb[2].mxu0 %vm167_vm8, %v147_v9 }
  0x98   :  { %807 = vmatpush1.bf16.msra.mxu1 %v806_v8  ;;  %754 = vmatprep.mubr.msk.f32.mxu0 %vm878_vm2, %v879_v1 }
  0x99   :  { %808 = vmatprep.subr.bf16.mxu1 %v871_v10 }
  0x9c   :  { %810 = vmatpush1.bf16.msra.mxu1 %v809_v13 }
  0x9d   :  { %811 = vmatprep.subr.bf16.mxu1 %v871_v10 }
 0x165   :  { %v742_v20 = vpop.f32.mrb[0].mxu0 }
 0x166   :  { %v252_v22 = vadd.f32 %v742_v20, %v685_v17  ;;  %v246_v23 = vpop.f32.mrb[1].mxu0  ;;  %v481_v20 = vld [vmem:[%s1235_s5 + $0xb0] sm:$0xff] }
 0x167   :  { %v247_v26 = vadd.f32 %v685_v17, %v246_v23 }
 0x168   :  { %v266_v27 = vmax.f32 %v252_v22, 0.0  ;;  %v815_v22 = vpack.c.bf16 %v482_v21, %v481_v20 }
 0x169   :  { %v265_v30 = vmax.f32 %v247_v26, 0.0  ;;  %v484_v26 = vld [vmem:[%s1235_s5 + $0xc8] sm:$0xff] }
 0x16a   :  { %v323_v32 = vrot.slane %v266_v27, 1  ;;  %v745_v34 = vpop.f32.mrb[2].mxu0 }
 0x16b   :  { %v270_v35 = vrot.slane %v265_v30, 1  ;;  %v256_v36 = vpop.f32.mrb[3].mxu0  ;;  %v262_v48 = vadd.f32 %v745_v34, %v685_v17 }
 0x16c   :  { %v325_v37 = vmax.f32 %v266_v27, %v323_v32  ;;  %v257_v38 = vadd.f32 %v685_v17, %v256_v36  ;;  %v812_v17 = vpack.c.bf16 %v480_v16, %v479_v15  ;;  %v818_v27 = vpack.c.bf16 %v484_v26, %v483_v25 }
 0x16d   :  { %v272_v41 = vmax.f32 %v265_v30, %v270_v35  ;;  %v268_v57 = vmax.f32 %v262_v48, 0.0  ;;  %v577_v35 = vld [vmem:[%s1237_s7] sm:$0xff] }
 0x16e   :  { %v333_v43 = vrot.slane %v325_v37, %v1055_v33  ;;  %v267_v44 = vmax.f32 %v257_v38, 0.0  ;;  %v353_v50 = vcombine.high %v325_v37, %v325_v37  ;;  %813 = vmatpush1.bf16.msra.mxu1 %v812_v17 }
 0x16f   :  { %274 = vst.msk [vmem:[#allocation3] sm:$0x1] %vm273_vm9, %v272_v41  ;;  %v282_v52 = vrot.slane %v272_v41, %v1055_v33  ;;  %v430_v62 = vrot.slane %v268_v57, 1  ;;  %v295_v0 = vcombine.high %v272_v41, %v272_v41  ;;  %814 = vmatprep.subr.bf16.mxu1 %v871_v10 }
 0x170   :  { %339 = vrot.lane.b32.xlu1 %v333_v43, %s873_s14  ;;  %334 = vrot.lane.b32.xlu0 %v333_v43, %s870_s11  ;;  %v381_v45 = vrot.slane %v267_v44, 1  ;;  %v343_v51 = vcombine.high %v333_v43, %v333_v43  ;;  %v360_v58 = vrot.slane %v353_v50, %v1055_v33 }
 0x171   :  { %v1099_v63 = vcombine.high %v282_v52, %v282_v52  ;;  %v432_v4 = vmax.f32 %v268_v57, %v430_v62  ;;  %v302_v5 = vrot.slane %v295_v0, %v1055_v33  ;;  %v579_v62 = vld [vmem:[%s1237_s7 + $0x10] sm:$0xff] }
 0x172   :  { %v1076_v53 = vmax.f32 %v267_v44, %v381_v45  ;;  %v370_v14 = vcombine.high %v360_v58, %v360_v58  ;;  %816 = vmatpush1.bf16.msra.mxu1 %v815_v22 }
 0x173   :  { %v440_v9 = vrot.slane %v432_v4, %v1055_v33  ;;  %v312_v19 = vcombine.high %v302_v5, %v302_v5  ;;  %817 = vmatprep.subr.bf16.mxu1 %v871_v10 }
 0x174   :  { %349 = vrot.lane.b32.xlu1 %v343_v51, %s870_s11  ;;  %283 = vrot.lane.b32.xlu0 %v282_v52, %s874_s19  ;;  %384 = vst.msk [vmem:[#allocation3 + $0x2] sm:$0x1] %vm273_vm9, %v1076_v53  ;;  %v392_v18 = vrot.slane %v1076_v53, %v1055_v33  ;;  %v404_v24 = vcombine.high %v1076_v53, %v1076_v53 }
 0x175   :  { %v449_v34 = vcombine.high %v440_v9, %v440_v9 }
 0x176   :  { %v397_v23 = vcombine.high %v392_v18, %v392_v18  ;;  %v411_v30 = vrot.slane %v404_v24, %v1055_v33  ;;  %819 = vmatpush1.bf16.msra.mxu1 %v818_v27  ;;  %v578_v33 = vld [vmem:[%s1237_s7 + $0x8] sm:$0xff] }
 0x177   :  { %820 = vmatprep.subr.bf16.mxu1 %v871_v10  ;;  %v824_v36 = vpack.c.bf16 %v578_v33, %v577_v35 }
 0x178   :  { %366 = vrot.lane.b32.xlu1 %v360_v58, %s875_s22  ;;  %344 = vrot.lane.b32.xlu0 %v343_v51, %s875_s22  ;;  %v420_v32 = vcombine.high %v411_v30, %v411_v30 }
 0x179   :  { %825 = vmatpush3.bf16.msra.mxu0 %v824_v36 }
 0x17a   :  { %822 = vmatpush1.bf16.msra.mxu1 %v821_v31  ;;  %826 = vmatprep.subr.bf16.mxu0 %v871_v10 }
 0x17c   :  { %361 = vrot.lane.b32.xlu0 %v360_v58, %s876_s26  ;;  %288 = vrot.lane.b32.xlu1 %v1099_v63, %s877_s4 }
 0x180   :  { %303 = vrot.lane.b32.xlu0 %v302_v5, %s869_s28  ;;  %308 = vrot.lane.b32.xlu1 %v302_v5, %s877_s4 }
 0x184   :  { %441 = vrot.lane.b32.xlu0 %v440_v9, %s870_s11  ;;  %445 = vrot.lane.b32.xlu1 %v440_v9, %s873_s14 }
 0x188   :  { %371 = vrot.lane.b32.xlu0 %v370_v14, %s874_s19  ;;  %376 = vrot.lane.b32.xlu1 %v370_v14, %s876_s26 }
 0x18c   :  { %393 = vrot.lane.b32.xlu0 %v392_v18, %s874_s19  ;;  %313 = vrot.lane.b32.xlu1 %v312_v19, %s873_s14 }
 0x190   :  { %318 = vrot.lane.b32.xlu0 %v312_v19, %s869_s28  ;;  %398 = vrot.lane.b32.xlu1 %v397_v23, %s877_s4 }
 0x194   :  { %412 = vrot.lane.b32.xlu0 %v411_v30, %s869_s28  ;;  %416 = vrot.lane.b32.xlu1 %v411_v30, %s877_s4 }
 0x198   :  { %421 = vrot.lane.b32.xlu0 %v420_v32, %s873_s14  ;;  %425 = vrot.lane.b32.xlu1 %v420_v32, %s869_s28 }
 0x19c   :  { %450 = vrot.lane.b32.xlu0 %v449_v34, %s875_s22  ;;  %454 = vrot.lane.b32.xlu1 %v449_v34, %s870_s11 }
 0x1e2   :  { %v340_v37 = vpop.permute.xlu1 %339  ;;  %v335_v38 = vpop.permute.xlu0 %334 }
 0x1e6   :  { %v350_v39 = vpop.permute.xlu1 %349  ;;  %v284_v40 = vpop.permute.xlu0 %283 }
 0x1e7   :  { %286 = vst.msk [vmem:[#allocation3 + $0x1] sm:$0x1] %vm273_vm9, %v284_v40 }
 0x1e8   :  { %294 = vst.msk [vmem:[#allocation3 + $0x1] sm:$0x1] %vm291_vm10, %v1099_v63  ;;  %v580_v63 = vld [vmem:[%s1237_s7 + $0x18] sm:$0xff]  ;;  %s673_s7 = sshll.u32 %s880_s6, 4  ;;  %s674_s7 = int_to_ptr.vmem [resolvable:$true] %s673_s7 }
 0x1e9   :  { %v827_v0 = vpack.c.bf16 %v580_v63, %v579_v62  ;;  %s845_s2 = scalar_lea.vmem %s674_s7, 32  ;;  %p850_p1 = scmp.lt.s32.totalorder %s674_s7, %s674_s7 }
 0x1ea   :  { %v367_v41 = vpop.permute.xlu1 %366  ;;  %v345_v42 = vpop.permute.xlu0 %344  ;;  %p846_p0 = scmp.ne.s32.totalorder %s674_s7, %s845_s2  ;;  %p851_p2 = scmp.lt.s32.totalorder %s845_s2, %s845_s2 }
 0x1eb   :  { %828 = vmatpush3.bf16.msra.mxu0 %v827_v0 }
 0x1ec   :  { %p852_p3 = por %p851_p2, %p850_p1 }
 0x1ee   :  { %v362_v43 = vpop.permute.xlu0 %361  ;;  %v289_v44 = vpop.permute.xlu1 %288  ;;  %p853_p4 = pnand %p852_p3, %p846_p0 }
 0x1ef   :  { %292 = vst.msk [vmem:[#allocation3] sm:$0x1] %vm291_vm10, %v289_v44 }
 0x1f2   :  { %v304_v45 = vpop.permute.xlu0 %303  ;;  %v309_v46 = vpop.permute.xlu1 %308 }
 0x1f3   :  { %307 = vst.msk [vmem:[#allocation3] sm:$0x1] %vm306_vm11, %v304_v45  ;;  %311 = vst.msk [vmem:[#allocation3 + $0x1] sm:$0x1] %vm306_vm11, %v309_v46 }
 0x1f6   :  { %v442_v10 = vpop.permute.xlu0 %441  ;;  %v446_v47 = vpop.permute.xlu1 %445 }
 0x1fa   :  { %v372_v48 = vpop.permute.xlu0 %371  ;;  %v377_v49 = vpop.permute.xlu1 %376 }
 0x1fe   :  { %v394_v50 = vpop.permute.xlu0 %393  ;;  %v314_v51 = vpop.permute.xlu1 %313 }
 0x1ff   :  { %396 = vst.msk [vmem:[#allocation3 + $0x3] sm:$0x1] %vm273_vm9, %v394_v50 }
 0x200   :  { %317 = vst.msk [vmem:[#allocation3] sm:$0x1] %vm316_vm12, %v314_v51 }
 0x201   :  { %403 = vst.msk [vmem:[#allocation3 + $0x3] sm:$0x1] %vm291_vm10, %v397_v23 }
 0x202   :  { %338 = vst.msk [vmem:[#allocation3] sm:$0x1] %vm337_vm13, %v335_v38  ;;  %v319_v52 = vpop.permute.xlu0 %318  ;;  %v399_v53 = vpop.permute.xlu1 %398 }
 0x203   :  { %348 = vst.msk [vmem:[#allocation3] sm:$0x1] %vm347_vm14, %v345_v42 }
 0x204   :  { %365 = vst.msk [vmem:[#allocation3] sm:$0x1] %vm364_vm15, %v362_v43 }
 0x205   :  { %321 = vst.msk [vmem:[#allocation3 + $0x1] sm:$0x1] %vm316_vm12, %v319_v52 }
 0x206   :  { %401 = vst.msk [vmem:[#allocation3 + $0x2] sm:$0x1] %vm291_vm10, %v399_v53  ;;  %v413_v54 = vpop.permute.xlu0 %412  ;;  %v417_v55 = vpop.permute.xlu1 %416 }
 0x207   :  { %375 = vst.msk [vmem:[#allocation3] sm:$0x1] %vm374_vm1, %v372_v48 }
 0x208   :  { %342 = vst.msk [vmem:[#allocation3 + $0x1] sm:$0x1] %vm337_vm13, %v340_v37 }
 0x209   :  { %352 = vst.msk [vmem:[#allocation3 + $0x1] sm:$0x1] %vm347_vm14, %v350_v39 }
 0x20a   :  { %369 = vst.msk [vmem:[#allocation3 + $0x1] sm:$0x1] %vm364_vm15, %v367_v41  ;;  %v422_v56 = vpop.permute.xlu0 %421  ;;  %v426_v57 = vpop.permute.xlu1 %425 }
 0x20b   :  { %415 = vst.msk [vmem:[#allocation3 + $0x2] sm:$0x1] %vm306_vm11, %v413_v54  ;;  %419 = vst.msk [vmem:[#allocation3 + $0x3] sm:$0x1] %vm306_vm11, %v417_v55 }
 0x20c   :  { %379 = vst.msk [vmem:[#allocation3 + $0x1] sm:$0x1] %vm374_vm1, %v377_v49 }
 0x20d   :  { %424 = vst.msk [vmem:[#allocation3 + $0x2] sm:$0x1] %vm316_vm12, %v422_v56  ;;  %428 = vst.msk [vmem:[#allocation3 + $0x3] sm:$0x1] %vm316_vm12, %v426_v57 }
 0x20e   :  { %444 = vst.msk [vmem:[#allocation3 + $0x2] sm:$0x1] %vm337_vm13, %v442_v10  ;;  %448 = vst.msk [vmem:[#allocation3 + $0x3] sm:$0x1] %vm337_vm13, %v446_v47  ;;  %v451_v58 = vpop.permute.xlu0 %450  ;;  %v455_v59 = vpop.permute.xlu1 %454 }
 0x20f   :  { %453 = vst.msk [vmem:[#allocation3 + $0x2] sm:$0x1] %vm347_vm14, %v451_v58  ;;  %457 = vst.msk [vmem:[#allocation3 + $0x3] sm:$0x1] %vm347_vm14, %v455_v59 }
 0x216   :  { %v691_v60 = vld.sshfl [vmem:[#allocation3] sm:$0x33 pattern:$0x76325410] }
 0x217   :  { %v502_v61 = vcombine.high %v691_v60, %v691_v60 }
 0x219   :  { %692 = vmatprep.mubr.msk.f32.mxu1 %vm167_vm8, %v502_v61 }
 0x21a   :  { %571 = vmatmul.mubr.f32.vlgmr.msra.gmra.mrb[0].mxu1 %v691_v60 }
 0x2ed   :  { %v572_v3 = vpop.f32.mrb[0].mxu1 }
 0x2ee   :  { %v573_v4 = vadd.f32 %v690_v2, %v572_v3  ;;  %v574_v5 = vpop.f32.mrb[1].mxu1 }
 0x2f0   :  { %v576_v6 = vmax.f32 %v573_v4, 0.0 }
 0x2f2   :  { %755 = vmatmul.mubr.msk.f32.vlgmr.msra.gmra.mrb[4].mxu0 %vm96_vm0, %v576_v6 }
 0x3c5   :  { %v657_v8 = vpop.f32.mrb[4].mxu0 }
 0x3c6   :  { %v658_v9 = vadd.f32 %v693_v7, %v657_v8  ;;  %v756_v11 = vpop.f32.mrb[5].mxu0 }
 0x3c8   :  { %v661_v12 = vsub.f32 0.0, %v658_v9 }
 0x3ca   :  { %v662_v13 = vmul.f32 1.442695, %v661_v12 }
 0x3cc   :  { %841 = vpow2.f32 %v662_v13 }
 0x3d6   :  { %v842_v14 = vpop.eup %841 }
 0x3d7   :  { %v664_v15 = vadd.f32 1.0, %v842_v14 }
 0x3d9   :  { %843 = vrcp.f32 %v664_v15 }
 0x3e3   :  { %v844_v16 = vpop.eup %843 }
 0x3e4   :  { %666 = vst [vmem:[#allocation4] sm:$0x3] %v844_v16 }
 0x3e5   :  { %856 = shalt.err (!%p853_p4)
}
 0x3e6   :  { %s857_s23 = scalar_lea.hbm %s1239_s9, 32 }
 0x3e7   :  { %p858_p5 = scmp.ne.s32.totalorder %s1239_s9, %s857_s23  ;;  %p861_p6 = scmp.lt.u32.totalorder %s857_s23, %s1239_s9 }
 0x3e9   :  { %p863_p7 = pnand %p861_p6, %p858_p5 }
 0x3eb   :  { %866 = shalt.err (!%p863_p7)
}
 0x3ec   :  { %676 = dma.vmem_to_hbm [thread:$0]  %s674_s7, 32, %s1239_s9, [#allocation5]  }
 0x3ed   :  { %867 = dma.done.wait [#allocation5], 32  }
 0x3ee   :  { %868 = vsyncadd [#allocation5], 4294967264 }
 0x3ef   :  { %680 = vsyncpa [#allocation5], 1 }

</bundles_post_ra>
